<compile_context>
chip_gen: v7x
topology: tpu7x:2x2x1
jax: 0.10.0
libtpu: 0.0.40
codegen_flags: <defaults>
</compile_context>

<pallas_src>
import functools

import jax
import jax.numpy as jnp
from jax import lax
from jax.experimental import pallas as pl
from jax.experimental.pallas import tpu as pltpu


# ----------------------------------------------------------------------------
# Fused kernel: k rounds of symmetric-normalized propagation + MLP head.
#   degs = clamp(in_degrees, 1); norm = degs**-0.5        (norm stays (N, 1))
#   repeat k times:  feat = norm * (A @ (norm * feat))
#   for all layers but last: feat = relu(feat @ W + b)    (dropout: eval no-op)
#   logits = feat @ W_last + b_last
# ----------------------------------------------------------------------------
def _sgc_fused_kernel(adj_ref, x_ref, *refs, k, num_layers):
    out_ref = refs[-1]
    wb_refs = refs[:-1]

    adj = adj_ref[...]                                              # (N, N) f32

    # Symmetric normalization factors (computed once; applied per round so no
    # transpose / explicit A_hat is ever materialized).
    # in-degree of node i = sum_j A[i, j]  (A is [dst, src])
    degs = jnp.maximum(jnp.sum(adj, axis=1, keepdims=True), 1.0)    # (N, 1)
    norm = lax.rsqrt(degs)                                          # degs**-0.5

    # --- k propagation rounds, statically unrolled --------------------------
    feat = x_ref[...]                                               # (N, D_in)
    for _ in range(k):
        feat = norm * jnp.dot(adj, norm * feat,
                              preferred_element_type=jnp.float32)

    # --- MLP head ------------------------------------------------------------
    # TODO(synk): BatchNorm1d (bn=True) and training-mode dropout unimplemented.
    for l in range(num_layers):
        w = wb_refs[2 * l][...]                                     # (D_prev, D_next)
        b = wb_refs[2 * l + 1][...]                                 # (1, D_next)
        feat = jnp.dot(feat, w, preferred_element_type=jnp.float32) + b
        if l < num_layers - 1:
            feat = jnp.maximum(feat, 0.0)                           # ReLU

    out_ref[...] = feat.astype(out_ref.dtype)


# ----------------------------------------------------------------------------
# Wrapper: single fused pallas_call, everything resident in VMEM, no grid.
# ----------------------------------------------------------------------------
@functools.partial(jax.jit, static_argnames=("k", "batch_norm", "dropout"))
def sgc_forward(adj, x, params, *, k, batch_norm=False, dropout=0.0):
    # Fail loudly (at trace time) on configs the fused kernel does not cover.
    if batch_norm:
        raise NotImplementedError("SGC Pallas kernel: batch_norm=True unsupported")
    if dropout > 0.0:
        raise NotImplementedError("SGC Pallas kernel: training-mode dropout unsupported")

    n, d_in = x.shape
    num_layers = len(params)
    d_out = params[-1][0].shape[1]

    # Advisory cost estimate (latency-bound micro-kernel).
    flops = n * n + n                                # degree sum + clamp
    flops += k * (2 * n * n * d_in + 4 * n * d_in)   # matmuls + 2x norm scaling
    prev = d_in
    for w, _ in params:
        dout = w.shape[1]
        flops += 2 * n * prev * dout + 2 * n * dout  # dot + bias + relu
        prev = dout
    bytes_accessed = 4 * (n * n + n * d_in + n * d_out
                          + sum(w.size + b.size for w, b in params))

    vmem = pl.BlockSpec(memory_space=pltpu.MemorySpace.VMEM)
    flat_wb = [t for wb in params for t in wb]

    return pl.pallas_call(
        functools.partial(_sgc_fused_kernel, k=k, num_layers=num_layers),
        out_shape=jax.ShapeDtypeStruct((n, d_out), x.dtype),
        in_specs=[vmem] * (2 + 2 * num_layers),
        out_specs=vmem,
        cost_estimate=pl.CostEstimate(
            flops=flops, transcendentals=n, bytes_accessed=bytes_accessed),
    )(adj, x, *flat_wb)


# Pure-JAX reference (mirrors the PyTorch forward) for a sanity check.
def sgc_reference(adj, x, params, *, k):
    degs = jnp.maximum(jnp.sum(adj, axis=1, keepdims=True), 1.0)
    norm = degs ** -0.5
    feat = x
    for _ in range(k):
        feat = feat * norm
        feat = adj @ feat
        feat = feat * norm
    for w, b in params[:-1]:
        feat = jnp.maximum(feat @ w + b, 0.0)
    w, b = params[-1]
    return feat @ w + b


if __name__ == "__main__":
    key = jax.random.PRNGKey(0)

    # --- synthetic graph + features ---------------------------------------
    N = 64          # number of nodes
    D_DATA = 16     # args.d_data
    H_DIMS = [32]   # args.SGC_args['h_dims']
    K = 2           # args.SGC_args['k']

    k_adj, k_feat, k_w0, k_b0, k_w1, k_b1 = jax.random.split(key, 6)

    # dense adjacency A[dst, src], random edges + self-loops (no 0-in-degree)
    adj = jax.random.bernoulli(k_adj, p=0.1, shape=(N, N)).astype(jnp.float32)
    adj = jnp.maximum(adj, jnp.eye(N, dtype=jnp.float32))

    x = jax.random.normal(k_feat, (N, D_DATA), dtype=jnp.float32)

    # --- deterministic parameter init (PyTorch-Linear-like uniform) --------
    def init_linear(kw, kb, d_in, d_out):
        bound = 1.0 / (d_in ** 0.5)
        w = jax.random.uniform(kw, (d_in, d_out), jnp.float32, -bound, bound)
        b = jax.random.uniform(kb, (1, d_out), jnp.float32, -bound, bound)
        return w, b

    # feat_trans_layers: Linear(d_data, h_dims[0]), Linear(h_dims[-1], h_dims[-1])
    params = [
        init_linear(k_w0, k_b0, D_DATA, H_DIMS[0]),
        init_linear(k_w1, k_b1, H_DIMS[-1], H_DIMS[-1]),
    ]

    logits = sgc_forward(adj, x, params, k=K)
    logits = jax.block_until_ready(logits)

    ref = sgc_reference(adj, x, params, k=K)
    assert logits.shape == (N, H_DIMS[-1])
    assert jnp.allclose(logits, ref, atol=1e-4, rtol=1e-4)

    print("KERNEL_OK")
</pallas_src>

<mosaic_0001>
module attributes {stable_mosaic.version = 11 : i64} {
  func.func @_sgc_fused_kernel(%arg0: memref<64x64xf32, #tpu.memory_space<vmem>>, %arg1: memref<64x16xf32, #tpu.memory_space<vmem>>, %arg2: memref<16x32xf32, #tpu.memory_space<vmem>>, %arg3: memref<1x32xf32, #tpu.memory_space<vmem>>, %arg4: memref<32x32xf32, #tpu.memory_space<vmem>>, %arg5: memref<1x32xf32, #tpu.memory_space<vmem>>, %arg6: memref<64x32xf32, #tpu.memory_space<vmem>>) attributes {dimension_semantics = [], scalar_prefetch = 0 : i64, scratch_operands = 0 : i64, tpu.core_type = #tpu.core_type<tc>} {
    %c0 = arith.constant 0 : index
    %c0_0 = arith.constant 0 : index
    %0 = vector.load %arg0[%c0, %c0_0] : memref<64x64xf32, #tpu.memory_space<vmem>>, vector<64x64xf32>
    %cst = arith.constant dense<0.000000e+00> : vector<64xf32>
    %1 = vector.multi_reduction <add>, %0, %cst [1] : vector<64x64xf32> to vector<64xf32>
    %2 = vector.shape_cast %1 : vector<64xf32> to vector<64x1xf32>
    %cst_1 = arith.constant 1.000000e+00 : f32
    %3 = vector.broadcast %cst_1 : f32 to vector<64x1xf32>
    %4 = arith.maximumf %2, %3 : vector<64x1xf32>
    %5 = math.rsqrt %4 : vector<64x1xf32>
    %c0_2 = arith.constant 0 : index
    %c0_3 = arith.constant 0 : index
    %6 = vector.load %arg1[%c0_2, %c0_3] : memref<64x16xf32, #tpu.memory_space<vmem>>, vector<64x16xf32>
    %7 = vector.broadcast %5 : vector<64x1xf32> to vector<64x16xf32>
    %8 = arith.mulf %7, %6 : vector<64x16xf32>
    %cst_4 = arith.constant dense<0.000000e+00> : vector<64x16xf32>
    %9 = tpu.matmul %0, %8, %cst_4 {dimension_numbers = #tpu.dot_dimension_numbers<[1], [0], [0], [1], [0, 0, 1, 1], [], []>} : vector<64x64xf32>, vector<64x16xf32>, vector<64x16xf32> -> vector<64x16xf32>
    %10 = vector.broadcast %5 : vector<64x1xf32> to vector<64x16xf32>
    %11 = arith.mulf %10, %9 : vector<64x16xf32>
    %12 = vector.broadcast %5 : vector<64x1xf32> to vector<64x16xf32>
    %13 = arith.mulf %12, %11 : vector<64x16xf32>
    %cst_5 = arith.constant dense<0.000000e+00> : vector<64x16xf32>
    %14 = tpu.matmul %0, %13, %cst_5 {dimension_numbers = #tpu.dot_dimension_numbers<[1], [0], [0], [1], [0, 0, 1, 1], [], []>} : vector<64x64xf32>, vector<64x16xf32>, vector<64x16xf32> -> vector<64x16xf32>
    %15 = vector.broadcast %5 : vector<64x1xf32> to vector<64x16xf32>
    %16 = arith.mulf %15, %14 : vector<64x16xf32>
    %c0_6 = arith.constant 0 : index
    %c0_7 = arith.constant 0 : index
    %17 = vector.load %arg2[%c0_6, %c0_7] : memref<16x32xf32, #tpu.memory_space<vmem>>, vector<16x32xf32>
    %c0_8 = arith.constant 0 : index
    %c0_9 = arith.constant 0 : index
    %18 = vector.load %arg3[%c0_8, %c0_9] : memref<1x32xf32, #tpu.memory_space<vmem>>, vector<1x32xf32>
    %cst_10 = arith.constant dense<0.000000e+00> : vector<64x32xf32>
    %19 = tpu.matmul %16, %17, %cst_10 {dimension_numbers = #tpu.dot_dimension_numbers<[1], [0], [0], [1], [0, 0, 1, 1], [], []>} : vector<64x16xf32>, vector<16x32xf32>, vector<64x32xf32> -> vector<64x32xf32>
    %20 = vector.broadcast %18 : vector<1x32xf32> to vector<64x32xf32>
    %21 = arith.addf %19, %20 : vector<64x32xf32>
    %cst_11 = arith.constant 0.000000e+00 : f32
    %22 = vector.broadcast %cst_11 : f32 to vector<64x32xf32>
    %23 = arith.maximumf %21, %22 : vector<64x32xf32>
    %c0_12 = arith.constant 0 : index
    %c0_13 = arith.constant 0 : index
    %24 = vector.load %arg4[%c0_12, %c0_13] : memref<32x32xf32, #tpu.memory_space<vmem>>, vector<32x32xf32>
    %c0_14 = arith.constant 0 : index
    %c0_15 = arith.constant 0 : index
    %25 = vector.load %arg5[%c0_14, %c0_15] : memref<1x32xf32, #tpu.memory_space<vmem>>, vector<1x32xf32>
    %cst_16 = arith.constant dense<0.000000e+00> : vector<64x32xf32>
    %26 = tpu.matmul %23, %24, %cst_16 {dimension_numbers = #tpu.dot_dimension_numbers<[1], [0], [0], [1], [0, 0, 1, 1], [], []>} : vector<64x32xf32>, vector<32x32xf32>, vector<64x32xf32> -> vector<64x32xf32>
    %27 = vector.broadcast %25 : vector<1x32xf32> to vector<64x32xf32>
    %28 = arith.addf %26, %27 : vector<64x32xf32>
    %c0_17 = arith.constant 0 : index
    %c0_18 = arith.constant 0 : index
    %29 = vector.load %arg6[%c0_17, %c0_18] : memref<64x32xf32, #tpu.memory_space<vmem>>, vector<64x32xf32>
    tpu.vector_store %arg6[%c0_17, %c0_18], %28 {strides = array<i32>} : memref<64x32xf32, #tpu.memory_space<vmem>>, vector<64x32xf32>,
    return
  }
}

</mosaic_0001>

<bundles_post_ra>
// kernel: sgc_forward.1
= control target key start
LH: loop header
LB: loop body
LE: loop exit
PB: predicated region body
PF: predicated region fallthrough
CT: control target
= control target key end

     0   :  { %11 = vsyncpa [#allocation3], 0  ;;  %s928_s21 = smov [#allocation2]   ;;  %s1193_s0 = inlined_call_operand.vmem [shape: f32[64,64], index: 0, kind: input, shape index: {}]   ;;  %s1194_s1 = inlined_call_operand.vmem [shape: f32[64,16], index: 1, kind: input, shape index: {}]   ;;  %s1195_s2 = inlined_call_operand.vmem [shape: f32[16,32], index: 2, kind: input, shape index: {}]   ;;  %s1196_s3 = inlined_call_operand.vmem [shape: f32[1,32], index: 3, kind: input, shape index: {}]   ;;  %s1197_s4 = inlined_call_operand.hbm [shape: f32[32,32], index: 4, kind: input, shape index: {}]   ;;  %s1198_s5 = inlined_call_operand.vmem [shape: f32[1,32], index: 5, kind: input, shape index: {}]   ;;  %s1199_s6 = inlined_call_operand.vmem [shape: f32[64,32], index: 6, kind: output, shape index: {}]  }
   0x1   :  { %s25_s22 = sshll.u32 %s928_s21, 4  ;;  %s904_s25 = scalar_lea.hbm %s1197_s4, 512  ;;  %s26_s22 = int_to_ptr.vmem [resolvable:$true] %s25_s22 }
   0x2   :  { %p905_p0 = scmp.ne.s32.totalorder %s1197_s4, %s904_s25  ;;  %p908_p1 = scmp.lt.u32.totalorder %s904_s25, %s1197_s4 }
   0x4   :  { %p910_p2 = pnand %p908_p1, %p905_p0 }
   0x6   :  { %913 = shalt.err (!%p910_p2)
}
   0x7   :  { %s914_s30 = scalar_lea.vmem %s26_s22, 512  ;;  %p919_p4 = scmp.lt.s32.totalorder %s26_s22, %s26_s22 }
   0x8   :  { %p915_p3 = scmp.ne.s32.totalorder %s26_s22, %s914_s30  ;;  %p920_p5 = scmp.lt.s32.totalorder %s914_s30, %s914_s30 }
   0xa   :  { %p921_p6 = por %p920_p5, %p919_p4 }
   0xc   :  { %p922_p7 = pnand %p921_p6, %p915_p3 }
   0xe   :  { %925 = shalt.err (!%p922_p7)
}
   0xf   :  { %s929_s7 = smov 128   ;;  %s930_s8 = smov 8  }
  0x10   :  { %31 = dma.hbm_to_vmem [thread:$0]  %s1197_s4, 512, %s26_s22, [#allocation3], %s929_s7, %s929_s7, %s930_s8  }
  0x11   :  { %926 = dma.done.wait [#allocation3], 512  }
  0x12   :  { %927 = vsyncadd [#allocation3], 4294966784  ;;  %vm45_vm0 = vcmask 523264   ;;  %v981_v0 = vld [vmem:[%s1193_s0 + $0x10] sm:$0xff]  ;;  %v37_v1 = vld [vmem:[%s1193_s0] sm:$0xff]  ;;  %vm369_vm1 = vcmask 130048  }
  0x13   :  { %v989_v2 = vld [vmem:[%s1193_s0 + $0x18] sm:$0xff]  ;;  %v52_v3 = vsel %vm45_vm0, %v981_v0, 0.0  ;;  %v46_v4 = vsel %vm45_vm0, %v37_v1, 0.0  ;;  %v997_v5 = vld [vmem:[%s1193_s0 + $0x8] sm:$0xff]  ;;  %765 = vmatprep.mubr.msk.f32.mxu0 %vm45_vm0, %v37_v1  ;;  %793 = vmatprep.mubr.msk.f32.mxu1 %vm45_vm0, %v37_v1  ;;  %v1013_v9 = vld [vmem:[%s1193_s0 + $0x20] sm:$0xff]  ;;  %vm518_vm2 = vcmask 261120  }
  0x14   :  { %53 = vadd.xlane.f32.xlu1 %v52_v3  ;;  %47 = vadd.xlane.f32.xlu0 %v46_v4  ;;  %v55_v6 = vsel %vm45_vm0, %v989_v2, 0.0  ;;  %v49_v7 = vsel %vm45_vm0, %v997_v5, 0.0  ;;  %v1008_v8 = vld [vmem:[%s1193_s0 + $0x28] sm:$0xff]  ;;  %v58_v11 = vsel %vm45_vm0, %v1013_v9, 0.0  ;;  %v1022_v12 = vld [vmem:[%s1193_s0 + $0x38] sm:$0xff]  ;;  %v1027_v13 = vld [vmem:[%s1193_s0 + $0x30] sm:$0xff] }
  0x15   :  { %v61_v10 = vsel %vm45_vm0, %v1008_v8, 0.0  ;;  %v67_v14 = vsel %vm45_vm0, %v1022_v12, 0.0  ;;  %v64_v15 = vsel %vm45_vm0, %v1027_v13, 0.0  ;;  %v86_v33 = vld [vmem:[%s1194_s1] sm:$0xff]  ;;  %v87_v35 = vld [vmem:[%s1194_s1 + $0x8] sm:$0xff]  ;;  %v88_v36 = vld [vmem:[%s1194_s1 + $0x10] sm:$0xff] }
  0x16   :  { %v89_v37 = vld [vmem:[%s1194_s1 + $0x18] sm:$0xff]  ;;  %v91_v44 = vld [vmem:[%s1194_s1 + $0x28] sm:$0xff]  ;;  %v90_v45 = vld [vmem:[%s1194_s1 + $0x20] sm:$0xff] }
  0x17   :  { %v93_v52 = vld [vmem:[%s1194_s1 + $0x38] sm:$0xff]  ;;  %v92_v53 = vld [vmem:[%s1194_s1 + $0x30] sm:$0xff]  ;;  %v360_v60 = vld [vmem:[%s1195_s2] sm:$0xff] }
  0x18   :  { %56 = vadd.xlane.f32.xlu1 %v55_v6  ;;  %50 = vadd.xlane.f32.xlu0 %v49_v7  ;;  %v361_v61 = vld [vmem:[%s1195_s2 + $0x8] sm:$0xff] }
  0x19   :  { %v873_v62 = vpack.c.bf16 %v361_v61, %v360_v60 }
  0x1c   :  { %62 = vadd.xlane.f32.xlu1 %v61_v10  ;;  %59 = vadd.xlane.f32.xlu0 %v58_v11 }
  0x20   :  { %68 = vadd.xlane.f32.xlu1 %v67_v14  ;;  %65 = vadd.xlane.f32.xlu0 %v64_v15 }
  0xa1   :  { %v54_v16 = vpop.xlane.xlu1 %53  ;;  %v48_v17 = vpop.xlane.xlu0 %47 }
  0xa2   :  { %v72_v18 = vmax.f32 %v54_v16, 1.0  ;;  %v70_v19 = vmax.f32 %v48_v17, 1.0 }
  0xa4   :  { %888 = vrsqrt.f32 %v72_v18 }
  0xa5   :  { %v57_v20 = vpop.xlane.xlu1 %56  ;;  %v51_v21 = vpop.xlane.xlu0 %50  ;;  %890 = vrsqrt.f32 %v70_v19 }
  0xa6   :  { %v73_v22 = vmax.f32 %v57_v20, 1.0  ;;  %v71_v23 = vmax.f32 %v51_v21, 1.0 }
  0xa8   :  { %892 = vrsqrt.f32 %v73_v22 }
  0xa9   :  { %894 = vrsqrt.f32 %v71_v23  ;;  %v63_v24 = vpop.xlane.xlu1 %62  ;;  %v60_v25 = vpop.xlane.xlu0 %59 }
  0xaa   :  { %v75_v26 = vmax.f32 %v63_v24, 1.0  ;;  %v74_v27 = vmax.f32 %v60_v25, 1.0 }
  0xac   :  { %896 = vrsqrt.f32 %v75_v26 }
  0xad   :  { %898 = vrsqrt.f32 %v74_v27  ;;  %v69_v28 = vpop.xlane.xlu1 %68  ;;  %v66_v29 = vpop.xlane.xlu0 %65 }
  0xae   :  { %v77_v30 = vmax.f32 %v69_v28, 1.0  ;;  %v76_v31 = vmax.f32 %v66_v29, 1.0  ;;  %v1033_v32 = vpop.eup %888 }
  0xaf   :  { %v1038_v34 = vpop.eup %890  ;;  %v96_v42 = vmul.f32 %v1033_v32, %v88_v36  ;;  %v507_v36 = vld [vmem:[#allocation2] sm:$0xff] }
  0xb0   :  { %900 = vrsqrt.f32 %v77_v30  ;;  %v94_v40 = vmul.f32 %v1038_v34, %v86_v33 }
  0xb1   :  { %902 = vrsqrt.f32 %v76_v31 }
  0xb2   :  { %v1049_v38 = vpop.eup %892 }
  0xb3   :  { %v1051_v39 = vpop.eup %894  ;;  %v97_v43 = vmul.f32 %v1049_v38, %v89_v37  ;;  %v509_v37 = vld [vmem:[#allocation2 + $0x10] sm:$0xff] }
  0xb4   :  { %v95_v41 = vmul.f32 %v1051_v39, %v87_v35 }
  0xb5   :  { %v845_v50 = vpack.c.bf16 %v97_v43, %v96_v42 }
  0xb6   :  { %v1063_v46 = vpop.eup %896  ;;  %v841_v47 = vpack.c.bf16 %v95_v41, %v94_v40 }
  0xb7   :  { %v1065_v48 = vpop.eup %898  ;;  %v99_v49 = vmul.f32 %v1063_v46, %v91_v44 }
  0xb8   :  { %842 = vmatprep.subr.bf16.mxu0 %v841_v47  ;;  %v98_v51 = vmul.f32 %v1065_v48, %v90_v45 }
  0xb9   :  { %844 = vmatpush3.bf16.msra.mxu0 %v841_v47 }
  0xba   :  { %v1075_v54 = vpop.eup %900  ;;  %846 = vmatprep.subr.bf16.mxu0 %v845_v50  ;;  %v849_v55 = vpack.c.bf16 %v99_v49, %v98_v51 }
  0xbb   :  { %v1077_v56 = vpop.eup %902  ;;  %v101_v57 = vmul.f32 %v1075_v54, %v93_v52 }
  0xbc   :  { %v100_v58 = vmul.f32 %v1077_v56, %v92_v53 }
  0xbd   :  { %848 = vmatpush3.bf16.msra.mxu0 %v845_v50 }
  0xbe   :  { %850 = vmatprep.subr.bf16.mxu0 %v849_v55  ;;  %v853_v59 = vpack.c.bf16 %v101_v57, %v100_v58 }
  0xc1   :  { %852 = vmatpush3.bf16.msra.mxu0 %v849_v55 }
  0xc2   :  { %854 = vmatprep.subr.bf16.mxu0 %v853_v59 }
  0xc5   :  { %856 = vmatpush3.bf16.msra.mxu0 %v853_v59 }
  0xc6   :  { %874 = vmatprep.subr.bf16.mxu0 %v873_v62 }
  0xc8   :  { %766 = vmatmul.mubr.msk.f32.vlgmr.msra.gmra.mrb[0].mxu0 %vm45_vm0, %v997_v5 }
  0xc9   :  { %768 = vmatprep.mubr.msk.f32.mxu0 %vm45_vm0, %v981_v0  ;;  %876 = vmatpush3.bf16.msra.mxu0 %v873_v62 }
  0xcc   :  { %769 = vmatmul.mubr.msk.f32.gmra.mrb[2].mxu0 %vm45_vm0, %v989_v2 }
  0xcd   :  { %771 = vmatprep.mubr.msk.f32.mxu0 %vm45_vm0, %v1013_v9 }
  0xd0   :  { %772 = vmatmul.mubr.msk.f32.gmra.mrb[4].mxu0 %vm45_vm0, %v1008_v8 }
  0xd1   :  { %774 = vmatprep.mubr.msk.f32.mxu0 %vm45_vm0, %v1027_v13 }
  0xd4   :  { %775 = vmatmul.mubr.msk.f32.gmra.mrb[6].mxu0 %vm45_vm0, %v1022_v12 }
 0x19b   :  { %v767_v63 = vpop.f32.mrb[0].mxu0 }
 0x19c   :  { %v232_v1 = vmul.f32 %v1051_v39, %v767_v63  ;;  %v192_v3 = vpop.f32.mrb[1].mxu0 }
 0x19d   :  { %v231_v4 = vmul.f32 %v1038_v34, %v192_v3 }
 0x19e   :  { %v240_v6 = vmul.f32 %v1051_v39, %v232_v1 }
 0x19f   :  { %v239_v7 = vmul.f32 %v1038_v34, %v231_v4  ;;  %v770_v10 = vpop.f32.mrb[2].mxu0 }
 0x1a0   :  { %v234_v11 = vmul.f32 %v1049_v38, %v770_v10  ;;  %v202_v14 = vpop.f32.mrb[3].mxu0 }
 0x1a1   :  { %v233_v15 = vmul.f32 %v1033_v32, %v202_v14  ;;  %v857_v16 = vpack.c.bf16 %v240_v6, %v239_v7 }
 0x1a2   :  { %v242_v17 = vmul.f32 %v1049_v38, %v234_v11 }
 0x1a3   :  { %v241_v18 = vmul.f32 %v1033_v32, %v233_v15  ;;  %v773_v19 = vpop.f32.mrb[4].mxu0  ;;  %858 = vmatprep.subr.bf16.mxu1 %v857_v16 }
 0x1a4   :  { %v236_v20 = vmul.f32 %v1063_v46, %v773_v19  ;;  %v212_v21 = vpop.f32.mrb[5].mxu0  ;;  %860 = vmatpush3.bf16.msra.mxu1 %v857_v16 }
 0x1a5   :  { %v235_v22 = vmul.f32 %v1065_v48, %v212_v21  ;;  %v861_v23 = vpack.c.bf16 %v242_v17, %v241_v18  ;;  %v686_v17 = vld [vmem:[%s1198_s5] ss:$0 sm:$0xff] }
 0x1a6   :  { %v244_v24 = vmul.f32 %v1063_v46, %v236_v20 }
 0x1a7   :  { %v243_v25 = vmul.f32 %v1065_v48, %v235_v22  ;;  %v776_v26 = vpop.f32.mrb[6].mxu0  ;;  %862 = vmatprep.subr.bf16.mxu1 %v861_v23 }
 0x1a8   :  { %v238_v27 = vmul.f32 %v1075_v54, %v776_v26  ;;  %v222_v28 = vpop.f32.mrb[7].mxu0  ;;  %864 = vmatpush3.bf16.msra.mxu1 %v861_v23 }
 0x1a9   :  { %v237_v29 = vmul.f32 %v1077_v56, %v222_v28  ;;  %v865_v30 = vpack.c.bf16 %v244_v24, %v243_v25 }
 0x1aa   :  { %v246_v31 = vmul.f32 %v1075_v54, %v238_v27 }
 0x1ab   :  { %v245_v33 = vmul.f32 %v1077_v56, %v237_v29  ;;  %866 = vmatprep.subr.bf16.mxu1 %v865_v30 }
 0x1ac   :  { %868 = vmatpush3.bf16.msra.mxu1 %v865_v30 }
 0x1ad   :  { %v869_v35 = vpack.c.bf16 %v246_v31, %v245_v33 }
 0x1af   :  { %870 = vmatprep.subr.bf16.mxu1 %v869_v35 }
 0x1b0   :  { %872 = vmatpush3.bf16.msra.mxu1 %v869_v35 }
 0x1b3   :  { %794 = vmatmul.mubr.msk.f32.vlgmr.msra.gmra.mrb[0].mxu1 %vm45_vm0, %v997_v5  ;;  %v508_v5 = vld [vmem:[#allocation2 + $0x8] sm:$0xff] }
 0x1b4   :  { %796 = vmatprep.mubr.msk.f32.mxu1 %vm45_vm0, %v981_v0  ;;  %v877_v40 = vpack.c.bf16 %v508_v5, %v507_v36  ;;  %v510_v0 = vld [vmem:[#allocation2 + $0x18] sm:$0xff] }
 0x1b5   :  { %v881_v41 = vpack.c.bf16 %v510_v0, %v509_v37 }
 0x1b6   :  { %878 = vmatprep.subr.bf16.mxu1 %v877_v40 }
 0x1b7   :  { %797 = vmatmul.mubr.msk.f32.gmra.mrb[2].mxu1 %vm45_vm0, %v989_v2 }
 0x1b8   :  { %799 = vmatprep.mubr.msk.f32.mxu1 %vm45_vm0, %v1013_v9  ;;  %880 = vmatpush3.bf16.msra.mxu1 %v877_v40 }
 0x1b9   :  { %882 = vmatprep.subr.bf16.mxu1 %v881_v41 }
 0x1bb   :  { %800 = vmatmul.mubr.msk.f32.gmra.mrb[4].mxu1 %vm45_vm0, %v1008_v8 }
 0x1bc   :  { %802 = vmatprep.mubr.msk.f32.mxu1 %vm45_vm0, %v1027_v13  ;;  %884 = vmatpush3.bf16.msra.mxu1 %v881_v41 }
 0x1bf   :  { %803 = vmatmul.mubr.msk.f32.gmra.mrb[6].mxu1 %vm45_vm0, %v1022_v12 }
 0x286   :  { %v795_v2 = vpop.f32.mrb[0].mxu1 }
 0x287   :  { %v313_v9 = vpop.f32.mrb[1].mxu1  ;;  %v353_v13 = vmul.f32 %v1051_v39, %v795_v2 }
 0x288   :  { %v352_v8 = vmul.f32 %v1038_v34, %v313_v9 }
 0x28a   :  { %v798_v42 = vpop.f32.mrb[2].mxu1  ;;  %809 = vmatprep.mubr.msk.f32.mxu0 %vm369_vm1, %v352_v8 }
 0x28b   :  { %v323_v12 = vpop.f32.mrb[3].mxu1  ;;  %810 = vmatmul.mubr.msk.f32.vlgmr.msra.gmra.mrb[8].mxu0 %vm369_vm1, %v353_v13  ;;  %v355_v44 = vmul.f32 %v1049_v38, %v798_v42 }
 0x28c   :  { %v354_v43 = vmul.f32 %v1033_v32, %v323_v12 }
 0x28e   :  { %v801_v45 = vpop.f32.mrb[4].mxu1  ;;  %812 = vmatprep.mubr.msk.f32.mxu0 %vm369_vm1, %v354_v43 }
 0x28f   :  { %v333_v47 = vpop.f32.mrb[5].mxu1  ;;  %813 = vmatmul.mubr.msk.f32.gmra.mrb[10].mxu0 %vm369_vm1, %v355_v44  ;;  %v357_v39 = vmul.f32 %v1063_v46, %v801_v45 }
 0x290   :  { %v356_v34 = vmul.f32 %v1065_v48, %v333_v47  ;;  %v677_v48 = vld [vmem:[%s1196_s3] ss:$0 sm:$0xff] }
 0x292   :  { %v804_v49 = vpop.f32.mrb[6].mxu1  ;;  %815 = vmatprep.mubr.msk.f32.mxu0 %vm369_vm1, %v356_v34 }
 0x293   :  { %v343_v50 = vpop.f32.mrb[7].mxu1  ;;  %816 = vmatmul.mubr.msk.f32.gmra.mrb[12].mxu0 %vm369_vm1, %v357_v39  ;;  %v359_v38 = vmul.f32 %v1075_v54, %v804_v49 }
 0x294   :  { %v358_v32 = vmul.f32 %v1077_v56, %v343_v50 }
 0x296   :  { %818 = vmatprep.mubr.msk.f32.mxu0 %vm369_vm1, %v358_v32 }
 0x297   :  { %819 = vmatmul.mubr.msk.f32.gmra.mrb[14].mxu0 %vm369_vm1, %v359_v38 }
 0x35e   :  { %v811_v51 = vpop.f32.mrb[8].mxu0 }
 0x35f   :  { %v466_v46 = vadd.f32 %v811_v51, %v677_v48  ;;  %v460_v52 = vpop.f32.mrb[9].mxu0 }
 0x360   :  { %v461_v53 = vadd.f32 %v677_v48, %v460_v52 }
 0x361   :  { %v500_v58 = vmax.f32 %v466_v46, 0.0 }
 0x362   :  { %v499_v55 = vmax.f32 %v461_v53, 0.0  ;;  %v814_v57 = vpop.f32.mrb[10].mxu0 }
 0x363   :  { %v476_v59 = vadd.f32 %v814_v57, %v677_v48  ;;  %v470_v56 = vpop.f32.mrb[11].mxu0 }
 0x364   :  { %v471_v60 = vadd.f32 %v677_v48, %v470_v56  ;;  %829 = vmatprep.mubr.msk.f32.mxu1 %vm518_vm2, %v499_v55 }
 0x365   :  { %830 = vmatmul.mubr.msk.f32.vlgmr.msra.gmra.mrb[8].mxu1 %vm518_vm2, %v500_v58  ;;  %v502_v62 = vmax.f32 %v476_v59, 0.0 }
 0x366   :  { %v501_v54 = vmax.f32 %v471_v60, 0.0  ;;  %v817_v61 = vpop.f32.mrb[12].mxu0 }
 0x367   :  { %v486_v63 = vadd.f32 %v817_v61, %v677_v48  ;;  %v480_v1 = vpop.f32.mrb[13].mxu0 }
 0x368   :  { %v481_v3 = vadd.f32 %v677_v48, %v480_v1  ;;  %832 = vmatprep.mubr.msk.f32.mxu1 %vm518_vm2, %v501_v54 }
 0x369   :  { %833 = vmatmul.mubr.msk.f32.gmra.mrb[10].mxu1 %vm518_vm2, %v502_v62  ;;  %v504_v7 = vmax.f32 %v486_v63, 0.0 }
 0x36a   :  { %v503_v4 = vmax.f32 %v481_v3, 0.0  ;;  %v820_v6 = vpop.f32.mrb[14].mxu0 }
 0x36b   :  { %v496_v10 = vadd.f32 %v820_v6, %v677_v48  ;;  %v490_v11 = vpop.f32.mrb[15].mxu0 }
 0x36c   :  { %v491_v14 = vadd.f32 %v677_v48, %v490_v11  ;;  %835 = vmatprep.mubr.msk.f32.mxu1 %vm518_vm2, %v503_v4 }
 0x36d   :  { %836 = vmatmul.mubr.msk.f32.gmra.mrb[12].mxu1 %vm518_vm2, %v504_v7  ;;  %v506_v16 = vmax.f32 %v496_v10, 0.0 }
 0x36e   :  { %v505_v15 = vmax.f32 %v491_v14, 0.0 }
 0x370   :  { %838 = vmatprep.mubr.msk.f32.mxu1 %vm518_vm2, %v505_v15 }
 0x371   :  { %839 = vmatmul.mubr.msk.f32.gmra.mrb[14].mxu1 %vm518_vm2, %v506_v16 }
 0x438   :  { %v831_v18 = vpop.f32.mrb[8].mxu1 }
 0x439   :  { %v615_v19 = vadd.f32 %v831_v18, %v686_v17  ;;  %v609_v20 = vpop.f32.mrb[9].mxu1 }
 0x43a   :  { %v610_v21 = vadd.f32 %v686_v17, %v609_v20 }
 0x43b   :  { %649 = vst.msk [vmem:[%s1199_s6 + $0x8] sm:$0xff] %vm518_vm2, %v615_v19 }
 0x43c   :  { %648 = vst.msk [vmem:[%s1199_s6] sm:$0xff] %vm518_vm2, %v610_v21  ;;  %v834_v22 = vpop.f32.mrb[10].mxu1 }
 0x43d   :  { %v625_v23 = vadd.f32 %v834_v22, %v686_v17  ;;  %v619_v24 = vpop.f32.mrb[11].mxu1 }
 0x43e   :  { %v620_v25 = vadd.f32 %v686_v17, %v619_v24 }
 0x43f   :  { %651 = vst.msk [vmem:[%s1199_s6 + $0x18] sm:$0xff] %vm518_vm2, %v625_v23 }
 0x440   :  { %650 = vst.msk [vmem:[%s1199_s6 + $0x10] sm:$0xff] %vm518_vm2, %v620_v25  ;;  %v837_v26 = vpop.f32.mrb[12].mxu1 }
 0x441   :  { %v635_v27 = vadd.f32 %v837_v26, %v686_v17  ;;  %v629_v28 = vpop.f32.mrb[13].mxu1 }
 0x442   :  { %v630_v29 = vadd.f32 %v686_v17, %v629_v28 }
 0x443   :  { %653 = vst.msk [vmem:[%s1199_s6 + $0x28] sm:$0xff] %vm518_vm2, %v635_v27 }
 0x444   :  { %652 = vst.msk [vmem:[%s1199_s6 + $0x20] sm:$0xff] %vm518_vm2, %v630_v29  ;;  %v840_v30 = vpop.f32.mrb[14].mxu1 }
 0x445   :  { %v645_v31 = vadd.f32 %v840_v30, %v686_v17  ;;  %v639_v33 = vpop.f32.mrb[15].mxu1 }
 0x446   :  { %v640_v35 = vadd.f32 %v686_v17, %v639_v33 }
 0x447   :  { %655 = vst.msk [vmem:[%s1199_s6 + $0x38] sm:$0xff] %vm518_vm2, %v645_v31 }
 0x448   :  { %654 = vst.msk [vmem:[%s1199_s6 + $0x30] sm:$0xff] %vm518_vm2, %v640_v35 }
 0x449   :  { %660 = vsyncpa [#allocation3], 1 }

</bundles_post_ra>
